<compile_context>
chip_gen: v6e
topology: v6e:2x2x1
jax: 0.10.0
libtpu: 0.0.40
codegen_flags: <defaults>
</compile_context>

<pallas_src>
import functools

import jax
import jax.numpy as jnp
from jax.experimental import pallas as pl
from jax.experimental.pallas import tpu as pltpu

LN_EPS = 1e-5
_VMEM_TARGET_BYTES = 48 * 1024 * 1024   # working-set budget (v7x has 64 MiB/TC)
_VMEM_LIMIT_CAP = 64 * 1024 * 1024      # valid on v5e/v6e/v7x


def _round_up(a, m):
    return (a + m - 1) // m * m


def _lane_pad(d):
    # Multiples of 256 keep the v6e/v7x 256-wide MXU passes full; small dims only
    # need the 128-lane minimum (v5e's 128-wide MXU is indifferent).
    return _round_up(d, 128) if d <= 128 else _round_up(d, 256)


def _layer_norm(y, g, beta, d_model, out_dtype):
    """LayerNorm over the last dim of a lane-padded f32 tile (real width = d_model)."""
    d_pad = y.shape[-1]
    if d_model == d_pad:
        mean = jnp.mean(y, axis=-1, keepdims=True)
        yc = y - mean
        var = jnp.mean(yc * yc, axis=-1, keepdims=True)
    else:
        # Padded lane columns of y are exactly zero (zero-padded W2 cols, b2 and
        # residual), so sums over the padded tile equal sums over the real columns;
        # mask (y - mean) on padded columns before the variance.
        inv_d = jnp.float32(1.0 / d_model)
        mean = jnp.sum(y, axis=-1, keepdims=True) * inv_d
        lane = jax.lax.broadcasted_iota(jnp.int32, y.shape, 1)
        yc = jnp.where(lane < d_model, y - mean, 0.0)
        var = jnp.sum(yc * yc, axis=-1, keepdims=True) * inv_d
    normed = yc * jax.lax.rsqrt(var + LN_EPS)                 # EUP rsqrt
    return (normed * g + beta).astype(out_dtype)


def _ffn_resident_kernel(x_ref, w1_ref, b1_ref, w2_ref, b2_ref, g_ref, beta_ref,
                         o_ref, *, d_model):
    """One row tile; W1/W2 are VMEM-resident (constant index_map)."""
    x = x_ref[...]                                             # [tr, Dp] input dtype
    xc = x.astype(w1_ref.dtype)                                # bf16 for the MXU
    h = jnp.dot(xc, w1_ref[...], preferred_element_type=jnp.float32)   # [tr, Kp] f32
    h = jnp.maximum(h + b1_ref[...], 0.0)
    y = jnp.dot(h.astype(w2_ref.dtype), w2_ref[...],
                preferred_element_type=jnp.float32)            # [tr, Dp] f32
    # Dropout is identity in eval/inference mode.
    # TODO(synk): training-mode dropout (pltpu.prng_random_bits mask) not implemented.
    y = y + b2_ref[...] + x.astype(jnp.float32)                # residual, f32
    o_ref[...] = _layer_norm(y, g_ref[...], beta_ref[...], d_model, o_ref.dtype)


def _ffn_stream_kernel(x_ref, w1_ref, b1_ref, w2_ref, b2_ref, g_ref, beta_ref,
                       o_ref, acc_ref, xc_ref, *, d_model):
    """One (row_tile, k_tile) grid step; W1/W2 stream through VMEM, acc over k."""
    k = pl.program_id(1)
    nk = pl.num_programs(1)

    @pl.when(k == 0)
    def _init():
        acc_ref[...] = jnp.zeros_like(acc_ref)
        # Cache the bf16 cast of the (resident-over-k) x tile once per row tile.
        xc_ref[...] = x_ref[...].astype(xc_ref.dtype)

    h = jnp.dot(xc_ref[...], w1_ref[...], preferred_element_type=jnp.float32)
    h = jnp.maximum(h + b1_ref[...], 0.0)
    acc_ref[...] += jnp.dot(h.astype(w2_ref.dtype), w2_ref[...],
                            preferred_element_type=jnp.float32)

    # Dropout is identity in eval/inference mode.
    # TODO(synk): training-mode dropout (pltpu.prng_random_bits mask) not implemented.

    @pl.when(k == nk - 1)
    def _epilogue():
        y = acc_ref[...] + b2_ref[...] + x_ref[...].astype(jnp.float32)
        o_ref[...] = _layer_norm(y, g_ref[...], beta_ref[...], d_model, o_ref.dtype)


def prepare_ffn_params(w1, b1, w2, b2, gamma, beta, *, compute_dtype=jnp.bfloat16):
    """Pad to lane-aligned shapes and cast weights to the MXU dtype ONCE.

    For static inference weights this must be called once (outside the per-call
    path) so the f32 weights are not re-read/re-cast on every forward.
    """
    d_model, d_inner = w1.shape
    D_p = _lane_pad(d_model)
    K_p = _lane_pad(d_inner)
    w1p = jnp.pad(w1, ((0, D_p - d_model), (0, K_p - d_inner))).astype(compute_dtype)
    b1p = jnp.pad(b1, (0, K_p - d_inner)).reshape(1, K_p).astype(jnp.float32)
    w2p = jnp.pad(w2, ((0, K_p - d_inner), (0, D_p - d_model))).astype(compute_dtype)
    b2p = jnp.pad(b2, (0, D_p - d_model)).reshape(1, D_p).astype(jnp.float32)
    g_p = jnp.pad(gamma, (0, D_p - d_model)).reshape(1, D_p).astype(jnp.float32)
    be_p = jnp.pad(beta, (0, D_p - d_model)).reshape(1, D_p).astype(jnp.float32)
    return w1p, b1p, w2p, b2p, g_p, be_p


@functools.partial(jax.jit, static_argnames=("tile_rows", "tile_k", "force_stream"))
def position_wise_ffn(x, w1p, b1p, w2p, b2p, g_p, be_p, *,
                      tile_rows=None, tile_k=None, force_stream=False):
    """x: [batch, src_len, d_model]; padded params from prepare_ffn_params()."""
    B, S, D = x.shape
    rows = B * S
    D_p, K_p = w1p.shape
    assert w2p.shape == (K_p, D_p) and D_p >= D

    x_item = jnp.dtype(x.dtype).itemsize
    w_item = jnp.dtype(w1p.dtype).itemsize
    out_item = x_item
    sub = 8 if x_item >= 4 else (16 if x_item == 2 else 32)

    def pick_rows(default):
        tr = default if tile_rows is None else tile_rows
        tr = max(sub, _round_up(tr, sub))
        cap = _round_up(rows, sub)
        if rows >= 2 * sub:
            # Keep >= 2 row tiles so the "parallel" axis can use both v7x TCs.
            cap = _round_up((rows + 1) // 2, sub)
        return max(sub, min(tr, cap))

    def resident_bytes(tr):
        return (2 * (D_p * K_p + K_p * D_p) * w_item            # W1+W2 (double-buffered)
                + 2 * tr * D_p * (x_item + out_item)             # x / out tiles (dbuf)
                + tr * K_p * 4                                    # h intermediate (f32)
                + tr * D_p * (4 + w_item)                         # y f32 + xc temporaries
                + 8 * (K_p + 3 * D_p) * 4)                        # biases / gamma / beta

    def stream_bytes(tr, tk):
        return (2 * tr * D_p * (x_item + out_item)
                + 2 * (D_p * tk + tk * D_p) * w_item              # W1/W2 k-slices (dbuf)
                + tr * D_p * 4                                     # acc scratch
                + tr * D_p * w_item                                # cached bf16 x
                + tr * tk * 4                                      # h intermediate
                + 8 * (tk + 3 * D_p) * 4)

    # ---- choose resident vs streaming weights ----
    tr = pick_rows(512)
    use_resident = not force_stream
    if use_resident:
        floor = max(sub, min(tr, 128))
        while tr > floor and resident_bytes(tr) > _VMEM_TARGET_BYTES:
            tr = max(floor, _round_up(tr // 2, sub))
        use_resident = resident_bytes(tr) <= _VMEM_TARGET_BYTES

    if not use_resident:
        tr = pick_rows(1024)
        if tile_k is None:
            tk = 1024
            tk_align = 256 if (K_p > 128 and K_p % 256 == 0) else 128
        else:
            tk = tile_k
            tk_align = 128
        tk = max(tk_align, min(_round_up(tk, tk_align), K_p))
        while K_p % tk != 0:
            tk -= tk_align
        while tr > sub and stream_bytes(tr, tk) > _VMEM_TARGET_BYTES:
            tr = max(sub, _round_up(tr // 2, sub))

    rows_p = _round_up(rows, tr)
    n_row_tiles = rows_p // tr

    # ---- pad the activations (per-call, unavoidable) ----
    x2 = jnp.pad(x.reshape(rows, D), ((0, rows_p - rows), (0, D_p - D)))

    est = resident_bytes(tr) if use_resident else stream_bytes(tr, tk)
    vmem_limit = int(min(max(est + est // 4 + (2 << 20), 32 << 20), _VMEM_LIMIT_CAP))

    weight_bytes = (D_p * K_p + K_p * D_p) * w_item
    weight_passes = 1 if use_resident else n_row_tiles
    cost = pl.CostEstimate(
        flops=4 * rows_p * D_p * K_p,
        transcendentals=rows_p,
        bytes_accessed=(rows_p * D_p * (x_item + out_item)
                        + weight_passes * weight_bytes),
    )

    if use_resident:
        out = pl.pallas_call(
            functools.partial(_ffn_resident_kernel, d_model=D),
            out_shape=jax.ShapeDtypeStruct((rows_p, D_p), x.dtype),
            grid_spec=pltpu.PrefetchScalarGridSpec(
                num_scalar_prefetch=0,
                grid=(n_row_tiles,),
                in_specs=[
                    pl.BlockSpec((tr, D_p), lambda i: (i, 0)),     # x row tile
                    pl.BlockSpec((D_p, K_p), lambda i: (0, 0)),    # W1 (resident)
                    pl.BlockSpec((1, K_p), lambda i: (0, 0)),      # b1
                    pl.BlockSpec((K_p, D_p), lambda i: (0, 0)),    # W2 (resident)
                    pl.BlockSpec((1, D_p), lambda i: (0, 0)),      # b2
                    pl.BlockSpec((1, D_p), lambda i: (0, 0)),      # gamma
                    pl.BlockSpec((1, D_p), lambda i: (0, 0)),      # beta
                ],
                out_specs=pl.BlockSpec((tr, D_p), lambda i: (i, 0)),
            ),
            compiler_params=pltpu.CompilerParams(
                dimension_semantics=("parallel",),
                vmem_limit_bytes=vmem_limit,
            ),
            cost_estimate=cost,
        )(x2, w1p, b1p, w2p, b2p, g_p, be_p)
    else:
        out = pl.pallas_call(
            functools.partial(_ffn_stream_kernel, d_model=D),
            out_shape=jax.ShapeDtypeStruct((rows_p, D_p), x.dtype),
            grid_spec=pltpu.PrefetchScalarGridSpec(
                num_scalar_prefetch=0,
                grid=(n_row_tiles, K_p // tk),
                in_specs=[
                    pl.BlockSpec((tr, D_p), lambda i, k: (i, 0)),  # x row tile (resident over k)
                    pl.BlockSpec((D_p, tk), lambda i, k: (0, k)),  # W1 k-slice (streams)
                    pl.BlockSpec((1, tk), lambda i, k: (0, k)),    # b1 k-slice
                    pl.BlockSpec((tk, D_p), lambda i, k: (k, 0)),  # W2 k-slice (streams)
                    pl.BlockSpec((1, D_p), lambda i, k: (0, 0)),   # b2
                    pl.BlockSpec((1, D_p), lambda i, k: (0, 0)),   # gamma
                    pl.BlockSpec((1, D_p), lambda i, k: (0, 0)),   # beta
                ],
                out_specs=pl.BlockSpec((tr, D_p), lambda i, k: (i, 0)),
                scratch_shapes=[pltpu.VMEM((tr, D_p), jnp.float32),   # f32 accumulator
                                pltpu.VMEM((tr, D_p), w1p.dtype)],    # cached bf16 x tile
            ),
            compiler_params=pltpu.CompilerParams(
                dimension_semantics=("parallel", "arbitrary"),
                vmem_limit_bytes=vmem_limit,
            ),
            cost_estimate=cost,
        )(x2, w1p, b1p, w2p, b2p, g_p, be_p)

    return out[:rows, :D].reshape(B, S, D)


def _reference(x, w1, b1, w2, b2, gamma, beta, compute_dtype=jnp.bfloat16):
    """Pure-JAX reference with the same bf16-matmul / f32-epilogue precision."""
    residual = x.astype(jnp.float32)
    h = jnp.dot(x.astype(compute_dtype), w1.astype(compute_dtype),
                preferred_element_type=jnp.float32) + b1
    h = jnp.maximum(h, 0.0)
    y = jnp.dot(h.astype(compute_dtype), w2.astype(compute_dtype),
                preferred_element_type=jnp.float32) + b2
    y = y + residual
    mean = jnp.mean(y, axis=-1, keepdims=True)
    var = jnp.mean(jnp.square(y - mean), axis=-1, keepdims=True)
    return ((y - mean) * jax.lax.rsqrt(var + LN_EPS)) * gamma + beta


if __name__ == "__main__":
    def make_params(key, d_model, d_inner):
        kw1, kb1, kw2, kb2 = jax.random.split(key, 4)
        lim1 = 1.0 / jnp.sqrt(d_model)
        lim2 = 1.0 / jnp.sqrt(d_inner)
        w1 = jax.random.uniform(kw1, (d_model, d_inner), minval=-lim1, maxval=lim1,
                                dtype=jnp.float32)
        b1 = jax.random.uniform(kb1, (d_inner,), minval=-lim1, maxval=lim1,
                                dtype=jnp.float32)
        w2 = jax.random.uniform(kw2, (d_inner, d_model), minval=-lim2, maxval=lim2,
                                dtype=jnp.float32)
        b2 = jax.random.uniform(kb2, (d_model,), minval=-lim2, maxval=lim2,
                                dtype=jnp.float32)
        gamma = jnp.ones((d_model,), jnp.float32)   # LayerNorm default init
        beta = jnp.zeros((d_model,), jnp.float32)
        return w1, b1, w2, b2, gamma, beta

    key = jax.random.PRNGKey(0)

    # Case 1: module-sized small shapes (lane padding + masked LayerNorm, resident path).
    B, S, d_model, d_inner = 2, 8, 32, 64
    k1, k2 = jax.random.split(key)
    x = jax.random.normal(k1, (B, S, d_model), dtype=jnp.float32)
    raw = make_params(k2, d_model, d_inner)
    prepared = prepare_ffn_params(*raw)            # pad/cast ONCE, outside the hot path
    out = jax.block_until_ready(position_wise_ffn(x, *prepared))
    ref = _reference(x, *raw)
    assert out.shape == (B, S, d_model)
    assert jnp.allclose(out, ref, atol=2e-2, rtol=2e-2), "case-1 mismatch vs reference"

    # Case 2: lane-dense shapes, resident weights, multiple row tiles.
    B, S, d_model, d_inner = 2, 128, 128, 256
    k3, k4 = jax.random.split(k2)
    x = jax.random.normal(k3, (B, S, d_model), dtype=jnp.float32)
    raw = make_params(k4, d_model, d_inner)
    prepared = prepare_ffn_params(*raw)
    out = jax.block_until_ready(position_wise_ffn(x, *prepared))
    ref = _reference(x, *raw)
    assert out.shape == (B, S, d_model)
    assert jnp.allclose(out, ref, atol=2e-2, rtol=2e-2), "case-2 mismatch vs reference"

    # Case 3: force the streaming (k-accumulating) path to exercise it as well.
    out = jax.block_until_ready(
        position_wise_ffn(x, *prepared, tile_rows=64, tile_k=128, force_stream=True))
    assert out.shape == (B, S, d_model)
    assert jnp.allclose(out, ref, atol=2e-2, rtol=2e-2), "case-3 mismatch vs reference"

    print("KERNEL_OK")
</pallas_src>

<mosaic_0001>
module attributes {stable_mosaic.version = 11 : i64} {
  func.func @_ffn_resident_kernel(%arg0: i32, %arg1: memref<8x128xf32, #tpu.memory_space<vmem>>, %arg2: memref<128x128xbf16, #tpu.memory_space<vmem>>, %arg3: memref<1x128xf32, #tpu.memory_space<vmem>>, %arg4: memref<128x128xbf16, #tpu.memory_space<vmem>>, %arg5: memref<1x128xf32, #tpu.memory_space<vmem>>, %arg6: memref<1x128xf32, #tpu.memory_space<vmem>>, %arg7: memref<1x128xf32, #tpu.memory_space<vmem>>, %arg8: memref<8x128xf32, #tpu.memory_space<vmem>>) attributes {dimension_semantics = [#tpu.dimension_semantics<parallel>], iteration_bounds = array<i64: 2>, scalar_prefetch = 0 : i64, scratch_operands = 0 : i64, tpu.core_type = #tpu.core_type<tc>, window_params = [{transform_indices = @transform_0, window_bounds = array<i64: 8, 128>}, {pipeline_mode = #tpu.pipeline_mode<synchronous>, transform_indices = @transform_1, window_bounds = array<i64: 128, 128>}, {pipeline_mode = #tpu.pipeline_mode<synchronous>, transform_indices = @transform_2, window_bounds = array<i64: 1, 128>}, {pipeline_mode = #tpu.pipeline_mode<synchronous>, transform_indices = @transform_3, window_bounds = array<i64: 128, 128>}, {pipeline_mode = #tpu.pipeline_mode<synchronous>, transform_indices = @transform_4, window_bounds = array<i64: 1, 128>}, {pipeline_mode = #tpu.pipeline_mode<synchronous>, transform_indices = @transform_5, window_bounds = array<i64: 1, 128>}, {pipeline_mode = #tpu.pipeline_mode<synchronous>, transform_indices = @transform_6, window_bounds = array<i64: 1, 128>}, {transform_indices = @transform_7, window_bounds = array<i64: 8, 128>}]} {
    %c0 = arith.constant 0 : index
    %c0_0 = arith.constant 0 : index
    %0 = vector.load %arg1[%c0, %c0_0] : memref<8x128xf32, #tpu.memory_space<vmem>>, vector<8x128xf32>
    %1 = arith.truncf %0 : vector<8x128xf32> to vector<8x128xbf16>
    %c0_1 = arith.constant 0 : index
    %c0_2 = arith.constant 0 : index
    %2 = vector.load %arg2[%c0_1, %c0_2] : memref<128x128xbf16, #tpu.memory_space<vmem>>, vector<128x128xbf16>
    %cst = arith.constant dense<0.000000e+00> : vector<8x128xf32>
    %3 = tpu.matmul %1, %2, %cst {dimension_numbers = #tpu.dot_dimension_numbers<[1], [0], [0], [1], [0, 0, 1, 1], [], []>} : vector<8x128xbf16>, vector<128x128xbf16>, vector<8x128xf32> -> vector<8x128xf32>
    %c0_3 = arith.constant 0 : index
    %c0_4 = arith.constant 0 : index
    %4 = vector.load %arg3[%c0_3, %c0_4] : memref<1x128xf32, #tpu.memory_space<vmem>>, vector<1x128xf32>
    %5 = vector.broadcast %4 : vector<1x128xf32> to vector<8x128xf32>
    %6 = arith.addf %3, %5 : vector<8x128xf32>
    %cst_5 = arith.constant 0.000000e+00 : f32
    %7 = vector.broadcast %cst_5 : f32 to vector<8x128xf32>
    %8 = arith.maximumf %6, %7 : vector<8x128xf32>
    %9 = arith.truncf %8 : vector<8x128xf32> to vector<8x128xbf16>
    %c0_6 = arith.constant 0 : index
    %c0_7 = arith.constant 0 : index
    %10 = vector.load %arg4[%c0_6, %c0_7] : memref<128x128xbf16, #tpu.memory_space<vmem>>, vector<128x128xbf16>
    %cst_8 = arith.constant dense<0.000000e+00> : vector<8x128xf32>
    %11 = tpu.matmul %9, %10, %cst_8 {dimension_numbers = #tpu.dot_dimension_numbers<[1], [0], [0], [1], [0, 0, 1, 1], [], []>} : vector<8x128xbf16>, vector<128x128xbf16>, vector<8x128xf32> -> vector<8x128xf32>
    %c0_9 = arith.constant 0 : index
    %c0_10 = arith.constant 0 : index
    %12 = vector.load %arg5[%c0_9, %c0_10] : memref<1x128xf32, #tpu.memory_space<vmem>>, vector<1x128xf32>
    %13 = vector.broadcast %12 : vector<1x128xf32> to vector<8x128xf32>
    %14 = arith.addf %11, %13 : vector<8x128xf32>
    %15 = arith.addf %14, %0 : vector<8x128xf32>
    %c0_11 = arith.constant 0 : index
    %c0_12 = arith.constant 0 : index
    %16 = vector.load %arg6[%c0_11, %c0_12] : memref<1x128xf32, #tpu.memory_space<vmem>>, vector<1x128xf32>
    %c0_13 = arith.constant 0 : index
    %c0_14 = arith.constant 0 : index
    %17 = vector.load %arg7[%c0_13, %c0_14] : memref<1x128xf32, #tpu.memory_space<vmem>>, vector<1x128xf32>
    %cst_15 = arith.constant dense<0.000000e+00> : vector<8xf32>
    %18 = vector.multi_reduction <add>, %15, %cst_15 [1] : vector<8x128xf32> to vector<8xf32>
    %19 = vector.shape_cast %18 : vector<8xf32> to vector<8x1xf32>
    %cst_16 = arith.constant 3.125000e-02 : f32
    %20 = vector.broadcast %cst_16 : f32 to vector<8x1xf32>
    %21 = arith.mulf %19, %20 : vector<8x1xf32>
    %22 = tpu.iota {dimensions = array<i32: 1>} : vector<8x128xi32>
    %c32_i32 = arith.constant 32 : i32
    %23 = vector.broadcast %c32_i32 : i32 to vector<8x128xi32>
    %24 = arith.cmpi slt, %22, %23 : vector<8x128xi32>
    %25 = vector.broadcast %21 : vector<8x1xf32> to vector<8x128xf32>
    %26 = arith.subf %15, %25 : vector<8x128xf32>
    %cst_17 = arith.constant 0.000000e+00 : f32
    %27 = vector.broadcast %cst_17 : f32 to vector<8x128xf32>
    %28 = arith.select %24, %26, %27 : vector<8x128xi1>, vector<8x128xf32>
    %29 = arith.mulf %28, %28 : vector<8x128xf32>
    %cst_18 = arith.constant dense<0.000000e+00> : vector<8xf32>
    %30 = vector.multi_reduction <add>, %29, %cst_18 [1] : vector<8x128xf32> to vector<8xf32>
    %31 = vector.shape_cast %30 : vector<8xf32> to vector<8x1xf32>
    %cst_19 = arith.constant 3.125000e-02 : f32
    %32 = vector.broadcast %cst_19 : f32 to vector<8x1xf32>
    %33 = arith.mulf %31, %32 : vector<8x1xf32>
    %cst_20 = arith.constant 9.99999974E-6 : f32
    %34 = vector.broadcast %cst_20 : f32 to vector<8x1xf32>
    %35 = arith.addf %33, %34 : vector<8x1xf32>
    %36 = math.rsqrt %35 : vector<8x1xf32>
    %37 = vector.broadcast %36 : vector<8x1xf32> to vector<8x128xf32>
    %38 = arith.mulf %28, %37 : vector<8x128xf32>
    %39 = vector.broadcast %16 : vector<1x128xf32> to vector<8x128xf32>
    %40 = arith.mulf %38, %39 : vector<8x128xf32>
    %41 = vector.broadcast %17 : vector<1x128xf32> to vector<8x128xf32>
    %42 = arith.addf %40, %41 : vector<8x128xf32>
    %c0_21 = arith.constant 0 : index
    %c0_22 = arith.constant 0 : index
    %43 = vector.load %arg8[%c0_21, %c0_22] : memref<8x128xf32, #tpu.memory_space<vmem>>, vector<8x128xf32>
    tpu.vector_store %arg8[%c0_21, %c0_22], %42 {strides = array<i32>} : memref<8x128xf32, #tpu.memory_space<vmem>>, vector<8x128xf32>,
    return
  }
  func.func @transform_0(%arg0: i32) -> (i32, i32) {
    %c0_i32 = arith.constant 0 : i32
    %c0_i32_0 = arith.constant 0 : i32
    return %arg0, %c0_i32 : i32, i32
  }
  func.func @transform_1(%arg0: i32) -> (i32, i32) {
    %c0_i32 = arith.constant 0 : i32
    %c0_i32_0 = arith.constant 0 : i32
    %c0_i32_1 = arith.constant 0 : i32
    return %c0_i32, %c0_i32_0 : i32, i32
  }
  func.func @transform_2(%arg0: i32) -> (i32, i32) {
    %c0_i32 = arith.constant 0 : i32
    %c0_i32_0 = arith.constant 0 : i32
    %c0_i32_1 = arith.constant 0 : i32
    return %c0_i32, %c0_i32_0 : i32, i32
  }
  func.func @transform_3(%arg0: i32) -> (i32, i32) {
    %c0_i32 = arith.constant 0 : i32
    %c0_i32_0 = arith.constant 0 : i32
    %c0_i32_1 = arith.constant 0 : i32
    return %c0_i32, %c0_i32_0 : i32, i32
  }
  func.func @transform_4(%arg0: i32) -> (i32, i32) {
    %c0_i32 = arith.constant 0 : i32
    %c0_i32_0 = arith.constant 0 : i32
    %c0_i32_1 = arith.constant 0 : i32
    return %c0_i32, %c0_i32_0 : i32, i32
  }
  func.func @transform_5(%arg0: i32) -> (i32, i32) {
    %c0_i32 = arith.constant 0 : i32
    %c0_i32_0 = arith.constant 0 : i32
    %c0_i32_1 = arith.constant 0 : i32
    return %c0_i32, %c0_i32_0 : i32, i32
  }
  func.func @transform_6(%arg0: i32) -> (i32, i32) {
    %c0_i32 = arith.constant 0 : i32
    %c0_i32_0 = arith.constant 0 : i32
    %c0_i32_1 = arith.constant 0 : i32
    return %c0_i32, %c0_i32_0 : i32, i32
  }
  func.func @transform_7(%arg0: i32) -> (i32, i32) {
    %c0_i32 = arith.constant 0 : i32
    %c0_i32_0 = arith.constant 0 : i32
    return %arg0, %c0_i32 : i32, i32
  }
}

</mosaic_0001>

<bundles_post_ra>
// kernel: position_wise_ffn.1
= control target key start
LH: loop header
LB: loop body
LE: loop exit
PB: predicated region body
PF: predicated region fallthrough
CT: control target
= control target key end

     0   :  { %12 = vsyncpa [#allocation3], 0  ;;  %s976_s0 = inlined_call_operand.vmem [shape: f32[16,128], index: 0, kind: input, shape index: {}]   ;;  %s977_s1 = inlined_call_operand.hbm [shape: bf16[128,128], index: 1, kind: input, shape index: {}]   ;;  %s978_s2 = inlined_call_operand.vmem [shape: f32[1,128], index: 2, kind: input, shape index: {}]   ;;  %s979_s3 = inlined_call_operand.hbm [shape: bf16[128,128], index: 3, kind: input, shape index: {}]   ;;  %s980_s4 = inlined_call_operand.vmem [shape: f32[1,128], index: 4, kind: input, shape index: {}]   ;;  %s981_s5 = inlined_call_operand.vmem [shape: f32[1,128], index: 5, kind: input, shape index: {}]   ;;  %s982_s6 = inlined_call_operand.vmem [shape: f32[1,128], index: 6, kind: input, shape index: {}]   ;;  %s983_s7 = inlined_call_operand.vmem [shape: f32[16,128], index: 7, kind: output, shape index: {}]  }
   0x1   :  { %13 = vsyncpa [#allocation5], 0  ;;  %s895_s24 = smov 0  }
   0x2 LB: > { %s901_s25 = sadd.s32 4294967295, %s847_s24   ;;  %p641_p0 = scmp.ge.s32.totalorder %s847_s24, 1  ;;  %s847_s24 = sphi %s895_s24, %s19_s24  }
   0x3   : > { %p202_p1 = scmp.lt.s32.totalorder %s847_s24, 3  ;;  %s849_s26 = smov [#allocation2]  }
   0x4   : > { %s214_s27 = sshll.u32 %s849_s26, 4  ;;  %p745_p3 = scmp.eq.s32.totalorder %s901_s25, 0  ;;  %s215_s27 = int_to_ptr.vmem [resolvable:$true] %s214_s27 }
   0x5   : > { %p905_p2 = pnand %p641_p0, %p202_p1  ;;  %s850_s29 = smov [#allocation4]  }
   0x6   : > { %s230_s30 = sshll.u32 %s850_s29, 4  ;;  %s792_s9 = scalar_lea.vmem %s215_s27, 1024  ;;  %s231_s30 = int_to_ptr.vmem [resolvable:$true] %s230_s30 }
   0x7   : > { %p738_p4 = pneg %p905_p2  ;;  %p793_p7 = scmp.ne.s32.totalorder %s215_s27, %s792_s9 }
   0x8   : > { %p800_p10 = scmp.lt.s32.totalorder %s215_s27, %s215_s27  ;;  %p801_p11 = scmp.lt.s32.totalorder %s792_s9, %s792_s9 }
   0x9   : > { %p914_p5 = pnand %p745_p3, %p738_p4 }
   0xa   : > { %p802_p12 = por %p801_p11, %p800_p10 }
   0xb   : > { %p783_p6 = pneg %p914_p5 }
   0xd   : > { %p795_p8 = pnand %p793_p7, %p783_p6 }
   0xf   : > { %p796_p9 = pneg %p795_p8 }
  0x11   : > { %p803_p13 = pnand %p802_p12, %p796_p9 }
  0x13   : > { %806 = shalt.err (!%p803_p13)
}
  0x14   : > { %s851_s10 = smov 64   ;;  %s852_s11 = smov 4  }
  0x15   : > { %741 = dma.hbm_to_vmem [thread:$0]  (!%p914_p5), %s977_s1, 1024, %s215_s27, [#allocation3], %s851_s10, %s851_s10, %s852_s11  }
  0x16   : > { %s818_s14 = scalar_lea.vmem %s231_s30, 1024  ;;  %p826_p7 = scmp.lt.s32.totalorder %s231_s30, %s231_s30 }
  0x17   : > { %p819_p0 = scmp.ne.s32.totalorder %s231_s30, %s818_s14  ;;  %p827_p8 = scmp.lt.s32.totalorder %s818_s14, %s818_s14 }
  0x19   : > { %p821_p1 = pnand %p819_p0, %p783_p6  ;;  %p828_p10 = por %p827_p8, %p826_p7 }
  0x1b   : > { %p822_p4 = pneg %p821_p1 }
  0x1d   : > { %p829_p9 = pnand %p828_p10, %p822_p4 }
  0x1f   : > { %832 = shalt.err (!%p829_p9)
}
  0x20   : > { %744 = dma.hbm_to_vmem [thread:$0]  (!%p914_p5), %s979_s3, 1024, %s231_s30, [#allocation5], %s851_s10, %s851_s10, %s852_s11  }
  0x21   : > { %262 = sbr.rel (%p905_p2) target bundleno = 779 (0x30b), region = 48 }
  0x26   : > { %838 = dma.done.wait (%p745_p3), [#allocation3], 1024  }
  0x27   : > { %840 = vsyncadd (%p745_p3), [#allocation3], 4294966272 }
  0x28   : > { %842 = dma.done.wait (%p745_p3), [#allocation5], 1024  }
  0x29   : > { %844 = vsyncadd (%p745_p3), [#allocation5], 4294966272  ;;  %v853_v0 = vmov 0.0   ;;  %vm854_vm0 = vmmov 0   ;;  %v763_v1 = vld [vmem:[#allocation2 + $0x38] sm:$0xff]   ;;  %v764_v2 = vld [vmem:[#allocation2 + $0x30] sm:$0xff]   ;;  %v537_v34 = vlaneseq }
  0x2a   : > { %690 = vmatprep.subr.bf16.mxu0 %v853_v0  ;;  %706 = vmatprep.mubr.msk.bf16.mxu0 %vm854_vm0, %v853_v0  ;;  %v765_v3 = vld [vmem:[#allocation2 + $0x28] sm:$0xff]   ;;  %v771_v4 = vld [vmem:[#allocation4 + $0x38] sm:$0xff]   ;;  %v766_v5 = vld [vmem:[#allocation2 + $0x20] sm:$0xff]   ;;  %p296_p2 = scmp.lt.s32.totalorder %s901_s25, 1 }
  0x2b   : > { %710 = vmatprep.subr.bf16.mxu1 %v853_v0  ;;  %726 = vmatprep.mubr.msk.bf16.mxu1 %vm854_vm0, %v853_v0  ;;  %v772_v6 = vld [vmem:[#allocation4 + $0x30] sm:$0xff]   ;;  %v767_v7 = vld [vmem:[#allocation2 + $0x18] sm:$0xff]   ;;  %v773_v8 = vld [vmem:[#allocation4 + $0x28] sm:$0xff]   ;;  %v538_v35 = vand.u32 127, %v537_v34 }
  0x2c   : > { %691 = vmatpush3.bf16.msra.mxu0 %v763_v1  ;;  %711 = vmatpush3.bf16.msra.mxu1 %v771_v4  ;;  %s987_s25 = smov (!%p296_p2, %s901_s25), 1  ;;  %v768_v9 = vld [vmem:[#allocation2 + $0x10] sm:$0xff]   ;;  %v774_v10 = vld [vmem:[#allocation4 + $0x20] sm:$0xff]   ;;  %v769_v11 = vld [vmem:[#allocation2 + $0x8] sm:$0xff]  }
  0x2d   : > { %692 = vmatprep.subr.bf16.mxu0 %v853_v0  ;;  %712 = vmatprep.subr.bf16.mxu1 %v853_v0  ;;  %s648_s17 = sshll.u32 %s987_s25, 3  ;;  %v775_v12 = vld [vmem:[#allocation4 + $0x18] sm:$0xff]   ;;  %v770_v13 = vld [vmem:[#allocation2] sm:$0xff]   ;;  %v776_v15 = vld [vmem:[#allocation4 + $0x10] sm:$0xff]   ;;  %vm539_vm1 = vcmp.lt.s32.totalorder %v538_v35, 32 }
  0x2e   : > { %s299_s20 = scalar_lea.vmem %s976_s0, %s648_s17  ;;  %v777_v17 = vld [vmem:[#allocation4 + $0x8] sm:$0xff]   ;;  %v778_v18 = vld [vmem:[#allocation4] sm:$0xff]   ;;  %s303_s10 = scalar_lea.vmem %s983_s7, %s648_s17 }
  0x2f   : > { %v305_v14 = vld [vmem:[%s299_s20] sm:$0xff] }
  0x30   : > { %693 = vmatpush3.bf16.msra.mxu0 %v764_v2  ;;  %713 = vmatpush3.bf16.msra.mxu1 %v772_v6  ;;  %v306_v16 = vpack.c.bf16 %v305_v14, %v305_v14  ;;  %v650_v19 = vld [vmem:[%s978_s2] ss:$0 sm:$0xff] }
  0x31   : > { %694 = vmatprep.subr.bf16.mxu0 %v853_v0  ;;  %714 = vmatprep.subr.bf16.mxu1 %v853_v0  ;;  %v659_v27 = vld [vmem:[%s980_s4] ss:$0 sm:$0xff] }
  0x32   : > { %v668_v45 = vld [vmem:[%s981_s5] ss:$0 sm:$0xff] }
  0x33   : > { %v669_v47 = vld [vmem:[%s982_s6] ss:$0 sm:$0xff] }
  0x34   : > { %695 = vmatpush3.bf16.msra.mxu0 %v765_v3  ;;  %715 = vmatpush3.bf16.msra.mxu1 %v773_v8 }
  0x35   : > { %696 = vmatprep.subr.bf16.mxu0 %v853_v0  ;;  %716 = vmatprep.subr.bf16.mxu1 %v853_v0 }
  0x38   : > { %697 = vmatpush3.bf16.msra.mxu0 %v766_v5  ;;  %717 = vmatpush3.bf16.msra.mxu1 %v774_v10 }
  0x39   : > { %698 = vmatprep.subr.bf16.mxu0 %v853_v0  ;;  %718 = vmatprep.subr.bf16.mxu1 %v853_v0 }
  0x3c   : > { %699 = vmatpush3.bf16.msra.mxu0 %v767_v7  ;;  %719 = vmatpush3.bf16.msra.mxu1 %v775_v12 }
  0x3d   : > { %700 = vmatprep.subr.bf16.mxu0 %v853_v0  ;;  %720 = vmatprep.subr.bf16.mxu1 %v853_v0 }
  0x40   : > { %701 = vmatpush3.bf16.msra.mxu0 %v768_v9  ;;  %721 = vmatpush3.bf16.msra.mxu1 %v776_v15 }
  0x41   : > { %702 = vmatprep.subr.bf16.mxu0 %v853_v0  ;;  %722 = vmatprep.subr.bf16.mxu1 %v853_v0 }
  0x44   : > { %703 = vmatpush3.bf16.msra.mxu0 %v769_v11  ;;  %723 = vmatpush3.bf16.msra.mxu1 %v777_v17 }
  0x45   : > { %704 = vmatprep.subr.bf16.mxu0 %v853_v0  ;;  %724 = vmatprep.subr.bf16.mxu1 %v853_v0 }
  0x48   : > { %705 = vmatpush3.bf16.msra.mxu0 %v770_v13  ;;  %725 = vmatpush3.bf16.msra.mxu1 %v778_v18 }
  0x4b   : > { %707 = vmatmul.mubr.bf16.vlgmr.msra.gmra.mxu0 %v306_v16 }
 0x10b   : > { %v412_v20 = vpop.f32.mrf.mxu0 }
 0x10c   : > { %v413_v21 = vadd.f32 %v650_v19, %v412_v20 }
 0x10d   : > { %v708_v22 = vpop.f32.mrf.mxu0 }
 0x10e   : > { %v418_v23 = vmax.f32 %v413_v21, 0.0 }
 0x10f   : > { %v415_v24 = vpop.f32.mrf.mxu0 }
 0x110   : > { %v419_v25 = vpack.c.bf16 %v418_v23, %v418_v23 }
 0x111   : > { %v709_v26 = vpop.f32.mrf.mxu0 }
 0x112   : > { %727 = vmatmul.mubr.bf16.vlgmr.msra.gmra.mxu1 %v419_v25 }
 0x1d2   : > { %v525_v28 = vpop.f32.mrf.mxu1 }
 0x1d3   : > { %v526_v29 = vadd.f32 %v659_v27, %v525_v28 }
 0x1d4   : > { %v728_v30 = vpop.f32.mrf.mxu1 }
 0x1d5   : > { %v531_v31 = vadd.f32 %v526_v29, %v305_v14 }
 0x1d6   : > { %v528_v32 = vpop.f32.mrf.mxu1 }
 0x1d7   : > { %534 = vadd.xlane.f32.xlu0 %v531_v31 }
 0x1d8   : > { %v729_v33 = vpop.f32.mrf.mxu1 }
 0x260   : > { %v535_v36 = vpop.xlane.xlu0 %534 }
 0x261   : > { %v536_v37 = vmul.f32 0.03125, %v535_v36 }
 0x263   : > { %v540_v38 = vsub.f32 %v531_v31, %v536_v37 }
 0x265   : > { %v541_v39 = vsel %vm539_vm1, %v540_v38, 0.0 }
 0x266   : > { %v542_v40 = vmul.f32 %v541_v39, %v541_v39 }
 0x268   : > { %543 = vadd.xlane.f32.xlu0 %v542_v40 }
 0x2f1   : > { %v544_v41 = vpop.xlane.xlu0 %543 }
 0x2f2   : > { %v545_v42 = vmul.f32 0.03125, %v544_v41 }
 0x2f4   : > { %v546_v43 = vadd.f32 1e-05, %v545_v42 }
 0x2f6   : > { %779 = vrsqrt.f32 %v546_v43 }
 0x303   : > { %v780_v44 = vpop.eup %779 }
 0x304   : > { %v548_v46 = vmul.f32 %v780_v44, %v541_v39 }
 0x306   : > { %v555_v48 = vmul.f32 %v668_v45, %v548_v46 }
 0x308   : > { %v562_v49 = vadd.f32 %v669_v47, %v555_v48 }
 0x30a   : > { %563 = vst [vmem:[%s303_s10] sm:$0xff] %v562_v49 }
 0x30b PF: > { %s19_s24 = sadd.s32 1, %s847_s24  }
 0x30c   : > { %p16_p3 = scmp.ge.s32.totalorder %s19_s24, 4  }
 0x30e   :  { %18 = sbr.rel (!%p16_p3) target bundleno = 2 (0x2), region = 87 }
 0x313   :  { %583 = vsyncpa [#allocation3], 1 }
 0x314   :  { %585 = vsyncpa [#allocation3 + $0x1], 1 }
 0x315   :  { %586 = vsyncpa [#allocation5], 1 }

</bundles_post_ra>
